<compile_context>
chip_gen: v7x
topology: tpu7x:2x2x1
jax: 0.10.0
libtpu: 0.0.40
codegen_flags: <defaults>
</compile_context>

<pallas_src>
import jax
import jax.numpy as jnp
from jax.experimental import pallas as pl
from jax.experimental.pallas import tpu as pltpu

EPS = 1e-8
_SUB = 8  # sublanes per time chunk


def _make_sisdr_kernel(true_len):
    """Build the kernel with the true (unpadded) time length baked in."""
    inv_t = 1.0 / float(true_len)

    def kernel(est_ref, tgt_ref, out_ref, s_e, s_t, s_et, s_ee, s_tt):
        k = pl.program_id(1)

        @pl.when(k == 0)
        def _init():
            s_e[...] = jnp.zeros_like(s_e)
            s_t[...] = jnp.zeros_like(s_t)
            s_et[...] = jnp.zeros_like(s_et)
            s_ee[...] = jnp.zeros_like(s_ee)
            s_tt[...] = jnp.zeros_like(s_tt)

        e = est_ref[0, 0].astype(jnp.float32)   # (8, TILE_LANES)
        t = tgt_ref[0, 0].astype(jnp.float32)

        # raw moment accumulation (VPU elementwise only; reductions deferred)
        s_e[...] += e
        s_t[...] += t
        s_et[...] += e * t
        s_ee[...] += e * e
        s_tt[...] += t * t

        @pl.when(k == pl.num_programs(1) - 1)
        def _finalize():
            sum_e = jnp.sum(s_e[...])
            sum_t = jnp.sum(s_t[...])
            sum_et = jnp.sum(s_et[...])
            sum_ee = jnp.sum(s_ee[...])
            sum_tt = jnp.sum(s_tt[...])

            # centered (zero-mean) statistics from raw moments
            dot = sum_et - sum_e * sum_t * inv_t        # Σ e_c · t_c
            t_energy = sum_tt - sum_t * sum_t * inv_t   # Σ t_c²
            e_energy = sum_ee - sum_e * sum_e * inv_t   # Σ e_c²

            s_te = t_energy + EPS                       # s_target_energy + EPS
            alpha = dot / s_te                          # projection coefficient
            num = alpha * alpha * t_energy              # Σ scaled_target²
            den = e_energy - 2.0 * alpha * dot + num + EPS  # Σ e_noise² + EPS
            loss = 10.0 * jnp.log10(num / den + EPS)    # per-batch SI-SDR (dB)

            out_ref[...] = jnp.full(out_ref.shape, loss, dtype=jnp.float32)

    return kernel


def _pick_tile_lanes(T):
    # ~512 KiB (128K f32) per input tile: big enough to amortize the ~0.35 µs
    # per-grid-step overhead, small enough for v5e (16 MiB) / v7x scoped VMEM
    # once double-buffered and with the 5 accumulators.
    target_lanes = (128 * 1024) // _SUB
    lanes = min(target_lanes, pl.cdiv(T, _SUB))
    lanes = max(128, ((lanes + 127) // 128) * 128)  # multiple of 128 lanes
    return lanes


def bsrnn_espnet_eval_loss(ests, targets, tile_lanes=None):
    """Pallas equivalent of BSRNNESPNetEval.forward(ests, targets) -> scalar."""
    assert ests.shape == targets.shape and ests.ndim == 2, \
        "Inputs must be of shape [batch, time]"
    B, T = ests.shape

    if tile_lanes is None:
        tile_lanes = _pick_tile_lanes(T)
    chunk = _SUB * tile_lanes
    n_chunks = pl.cdiv(T, chunk)
    t_pad = n_chunks * chunk
    if t_pad != T:
        pad = ((0, 0), (0, t_pad - T))
        ests = jnp.pad(ests, pad)        # zeros do not pollute raw moments;
        targets = jnp.pad(targets, pad)  # centering uses the true T (closure)

    e4 = ests.reshape(B, n_chunks, _SUB, tile_lanes)
    t4 = targets.reshape(B, n_chunks, _SUB, tile_lanes)

    chunk_spec = pl.BlockSpec((1, 1, _SUB, tile_lanes),
                              lambda b, k: (b, k, 0, 0))

    losses = pl.pallas_call(
        _make_sisdr_kernel(T),
        out_shape=jax.ShapeDtypeStruct((B, _SUB, 128), jnp.float32),
        grid_spec=pltpu.PrefetchScalarGridSpec(
            num_scalar_prefetch=0,
            grid=(B, n_chunks),
            in_specs=[chunk_spec, chunk_spec],
            out_specs=pl.BlockSpec((1, _SUB, 128), lambda b, k: (b, 0, 0)),
            scratch_shapes=[pltpu.VMEM((_SUB, tile_lanes), jnp.float32)] * 5,
        ),
        compiler_params=pltpu.CompilerParams(
            dimension_semantics=("parallel", "arbitrary")),
        cost_estimate=pl.CostEstimate(
            flops=8 * B * t_pad,
            transcendentals=B,
            bytes_accessed=2 * B * t_pad * 4 + B * _SUB * 128 * 4),
    )(e4, t4)

    # reduction='mean', then negate (SingleSrcNegSDR returns -losses)
    return -jnp.mean(losses[:, 0, 0])


def _reference_loss(ests, targets):
    """Pure-JAX reference mirroring the PyTorch module."""
    t = targets - jnp.mean(targets, axis=1, keepdims=True)
    e = ests - jnp.mean(ests, axis=1, keepdims=True)
    dot = jnp.sum(e * t, axis=1, keepdims=True)
    s_te = jnp.sum(t ** 2, axis=1, keepdims=True) + EPS
    st = dot * t / s_te
    en = e - st
    losses = jnp.sum(st ** 2, axis=1) / (jnp.sum(en ** 2, axis=1) + EPS)
    losses = 10.0 * jnp.log10(losses + EPS)
    return -jnp.mean(losses)


if __name__ == "__main__":
    # BSRNNESPNetEval(n_fft, hop_length, win_length): the STFT params are not
    # used in forward(); the module is parameter-free, forward() is pure SI-SDR.
    key = jax.random.PRNGKey(0)
    k1, k2 = jax.random.split(key)

    # main shape: [batch, time]
    B, T = 2, 4000
    ests = jax.random.normal(k1, (B, T), dtype=jnp.float32)
    targets = 0.5 * jax.random.normal(k2, (B, T), dtype=jnp.float32) + 0.3 * ests

    loss = jax.block_until_ready(bsrnn_espnet_eval_loss(ests, targets))
    ref = jax.block_until_ready(_reference_loss(ests, targets))
    assert jnp.allclose(loss, ref, rtol=1e-4, atol=1e-3), (loss, ref)

    # tiny-T path (single chunk, zero padding inside the chunk)
    e2 = jax.random.normal(jax.random.PRNGKey(1), (2, 256), dtype=jnp.float32)
    t2 = jax.random.normal(jax.random.PRNGKey(2), (2, 256), dtype=jnp.float32)
    loss2 = jax.block_until_ready(bsrnn_espnet_eval_loss(e2, t2))
    ref2 = jax.block_until_ready(_reference_loss(e2, t2))
    assert jnp.allclose(loss2, ref2, rtol=1e-4, atol=1e-3), (loss2, ref2)

    # forced multi-chunk path (exercises the streaming accumulator + padding)
    loss3 = jax.block_until_ready(
        bsrnn_espnet_eval_loss(ests, targets, tile_lanes=128))
    assert jnp.allclose(loss3, ref, rtol=1e-4, atol=1e-3), (loss3, ref)

    print("KERNEL_OK")
</pallas_src>

<mosaic_0001>
module attributes {stable_mosaic.version = 11 : i64} {
  func.func @kernel(%arg0: i32, %arg1: i32, %arg2: memref<1x1x8x512xf32, #tpu.memory_space<vmem>>, %arg3: memref<1x1x8x512xf32, #tpu.memory_space<vmem>>, %arg4: memref<1x8x128xf32, #tpu.memory_space<vmem>>, %arg5: memref<8x512xf32, #tpu.memory_space<vmem>>, %arg6: memref<8x512xf32, #tpu.memory_space<vmem>>, %arg7: memref<8x512xf32, #tpu.memory_space<vmem>>, %arg8: memref<8x512xf32, #tpu.memory_space<vmem>>, %arg9: memref<8x512xf32, #tpu.memory_space<vmem>>) attributes {dimension_semantics = [#tpu.dimension_semantics<parallel>, #tpu.dimension_semantics<arbitrary>], iteration_bounds = array<i64: 2, 1>, scalar_prefetch = 0 : i64, scratch_operands = 5 : i64, tpu.core_type = #tpu.core_type<tc>, window_params = [{transform_indices = @transform_0, window_bounds = array<i64: 1, 1, 8, 512>}, {transform_indices = @transform_1, window_bounds = array<i64: 1, 1, 8, 512>}, {transform_indices = @transform_2, window_bounds = array<i64: 1, 8, 128>}]} {
    %c0_i32 = arith.constant 0 : i32
    %0 = arith.cmpi eq, %arg1, %c0_i32 : i32
    %1 = arith.extui %0 : i1 to i32
    %c0_i32_0 = arith.constant 0 : i32
    %2 = arith.cmpi ne, %1, %c0_i32_0 : i32
    scf.if %2 {
      %cst = arith.constant 0.000000e+00 : f32
      %28 = vector.broadcast %cst : f32 to vector<8x512xf32>
      %c0_30 = arith.constant 0 : index
      %c0_31 = arith.constant 0 : index
      %29 = vector.load %arg5[%c0_30, %c0_31] : memref<8x512xf32, #tpu.memory_space<vmem>>, vector<8x512xf32>
      tpu.vector_store %arg5[%c0_30, %c0_31], %28 {strides = array<i32>} : memref<8x512xf32, #tpu.memory_space<vmem>>, vector<8x512xf32>,
      %cst_32 = arith.constant 0.000000e+00 : f32
      %30 = vector.broadcast %cst_32 : f32 to vector<8x512xf32>
      %c0_33 = arith.constant 0 : index
      %c0_34 = arith.constant 0 : index
      %31 = vector.load %arg6[%c0_33, %c0_34] : memref<8x512xf32, #tpu.memory_space<vmem>>, vector<8x512xf32>
      tpu.vector_store %arg6[%c0_33, %c0_34], %30 {strides = array<i32>} : memref<8x512xf32, #tpu.memory_space<vmem>>, vector<8x512xf32>,
      %cst_35 = arith.constant 0.000000e+00 : f32
      %32 = vector.broadcast %cst_35 : f32 to vector<8x512xf32>
      %c0_36 = arith.constant 0 : index
      %c0_37 = arith.constant 0 : index
      %33 = vector.load %arg7[%c0_36, %c0_37] : memref<8x512xf32, #tpu.memory_space<vmem>>, vector<8x512xf32>
      tpu.vector_store %arg7[%c0_36, %c0_37], %32 {strides = array<i32>} : memref<8x512xf32, #tpu.memory_space<vmem>>, vector<8x512xf32>,
      %cst_38 = arith.constant 0.000000e+00 : f32
      %34 = vector.broadcast %cst_38 : f32 to vector<8x512xf32>
      %c0_39 = arith.constant 0 : index
      %c0_40 = arith.constant 0 : index
      %35 = vector.load %arg8[%c0_39, %c0_40] : memref<8x512xf32, #tpu.memory_space<vmem>>, vector<8x512xf32>
      tpu.vector_store %arg8[%c0_39, %c0_40], %34 {strides = array<i32>} : memref<8x512xf32, #tpu.memory_space<vmem>>, vector<8x512xf32>,
      %cst_41 = arith.constant 0.000000e+00 : f32
      %36 = vector.broadcast %cst_41 : f32 to vector<8x512xf32>
      %c0_42 = arith.constant 0 : index
      %c0_43 = arith.constant 0 : index
      %37 = vector.load %arg9[%c0_42, %c0_43] : memref<8x512xf32, #tpu.memory_space<vmem>>, vector<8x512xf32>
      tpu.vector_store %arg9[%c0_42, %c0_43], %36 {strides = array<i32>} : memref<8x512xf32, #tpu.memory_space<vmem>>, vector<8x512xf32>,
    } else {
    }
    %c0 = arith.constant 0 : index
    %c0_1 = arith.constant 0 : index
    %c0_2 = arith.constant 0 : index
    %c0_3 = arith.constant 0 : index
    %3 = vector.load %arg2[%c0, %c0_1, %c0_2, %c0_3] : memref<1x1x8x512xf32, #tpu.memory_space<vmem>>, vector<1x1x8x512xf32>
    %4 = vector.shape_cast %3 : vector<1x1x8x512xf32> to vector<8x512xf32>
    %c0_4 = arith.constant 0 : index
    %c0_5 = arith.constant 0 : index
    %c0_6 = arith.constant 0 : index
    %c0_7 = arith.constant 0 : index
    %5 = vector.load %arg3[%c0_4, %c0_5, %c0_6, %c0_7] : memref<1x1x8x512xf32, #tpu.memory_space<vmem>>, vector<1x1x8x512xf32>
    %6 = vector.shape_cast %5 : vector<1x1x8x512xf32> to vector<8x512xf32>
    %c0_8 = arith.constant 0 : index
    %c0_9 = arith.constant 0 : index
    %7 = vector.load %arg5[%c0_8, %c0_9] : memref<8x512xf32, #tpu.memory_space<vmem>>, vector<8x512xf32>
    %8 = arith.addf %7, %4 : vector<8x512xf32>
    %c0_10 = arith.constant 0 : index
    %c0_11 = arith.constant 0 : index
    %9 = vector.load %arg5[%c0_10, %c0_11] : memref<8x512xf32, #tpu.memory_space<vmem>>, vector<8x512xf32>
    tpu.vector_store %arg5[%c0_10, %c0_11], %8 {strides = array<i32>} : memref<8x512xf32, #tpu.memory_space<vmem>>, vector<8x512xf32>,
    %c0_12 = arith.constant 0 : index
    %c0_13 = arith.constant 0 : index
    %10 = vector.load %arg6[%c0_12, %c0_13] : memref<8x512xf32, #tpu.memory_space<vmem>>, vector<8x512xf32>
    %11 = arith.addf %10, %6 : vector<8x512xf32>
    %c0_14 = arith.constant 0 : index
    %c0_15 = arith.constant 0 : index
    %12 = vector.load %arg6[%c0_14, %c0_15] : memref<8x512xf32, #tpu.memory_space<vmem>>, vector<8x512xf32>
    tpu.vector_store %arg6[%c0_14, %c0_15], %11 {strides = array<i32>} : memref<8x512xf32, #tpu.memory_space<vmem>>, vector<8x512xf32>,
    %c0_16 = arith.constant 0 : index
    %c0_17 = arith.constant 0 : index
    %13 = vector.load %arg7[%c0_16, %c0_17] : memref<8x512xf32, #tpu.memory_space<vmem>>, vector<8x512xf32>
    %14 = arith.mulf %4, %6 : vector<8x512xf32>
    %15 = arith.addf %13, %14 : vector<8x512xf32>
    %c0_18 = arith.constant 0 : index
    %c0_19 = arith.constant 0 : index
    %16 = vector.load %arg7[%c0_18, %c0_19] : memref<8x512xf32, #tpu.memory_space<vmem>>, vector<8x512xf32>
    tpu.vector_store %arg7[%c0_18, %c0_19], %15 {strides = array<i32>} : memref<8x512xf32, #tpu.memory_space<vmem>>, vector<8x512xf32>,
    %c0_20 = arith.constant 0 : index
    %c0_21 = arith.constant 0 : index
    %17 = vector.load %arg8[%c0_20, %c0_21] : memref<8x512xf32, #tpu.memory_space<vmem>>, vector<8x512xf32>
    %18 = arith.mulf %4, %4 : vector<8x512xf32>
    %19 = arith.addf %17, %18 : vector<8x512xf32>
    %c0_22 = arith.constant 0 : index
    %c0_23 = arith.constant 0 : index
    %20 = vector.load %arg8[%c0_22, %c0_23] : memref<8x512xf32, #tpu.memory_space<vmem>>, vector<8x512xf32>
    tpu.vector_store %arg8[%c0_22, %c0_23], %19 {strides = array<i32>} : memref<8x512xf32, #tpu.memory_space<vmem>>, vector<8x512xf32>,
    %c0_24 = arith.constant 0 : index
    %c0_25 = arith.constant 0 : index
    %21 = vector.load %arg9[%c0_24, %c0_25] : memref<8x512xf32, #tpu.memory_space<vmem>>, vector<8x512xf32>
    %22 = arith.mulf %6, %6 : vector<8x512xf32>
    %23 = arith.addf %21, %22 : vector<8x512xf32>
    %c0_26 = arith.constant 0 : index
    %c0_27 = arith.constant 0 : index
    %24 = vector.load %arg9[%c0_26, %c0_27] : memref<8x512xf32, #tpu.memory_space<vmem>>, vector<8x512xf32>
    tpu.vector_store %arg9[%c0_26, %c0_27], %23 {strides = array<i32>} : memref<8x512xf32, #tpu.memory_space<vmem>>, vector<8x512xf32>,
    %c0_i32_28 = arith.constant 0 : i32
    %25 = arith.cmpi eq, %arg1, %c0_i32_28 : i32
    %26 = arith.extui %25 : i1 to i32
    %c0_i32_29 = arith.constant 0 : i32
    %27 = arith.cmpi ne, %26, %c0_i32_29 : i32
    scf.if %27 {
      %c0_30 = arith.constant 0 : index
      %c0_31 = arith.constant 0 : index
      %28 = vector.load %arg5[%c0_30, %c0_31] : memref<8x512xf32, #tpu.memory_space<vmem>>, vector<8x512xf32>
      %29 = vector.shape_cast %28 : vector<8x512xf32> to vector<1x8x512xf32>
      %cst = arith.constant dense<0.000000e+00> : vector<1xf32>
      %30 = vector.multi_reduction <add>, %29, %cst [1, 2] : vector<1x8x512xf32> to vector<1xf32>
      %31 = vector.shape_cast %30 : vector<1xf32> to vector<1x1x1xf32>
      %32 = vector.extract %31[0, 0, 0] : f32 from vector<1x1x1xf32>
      %c0_32 = arith.constant 0 : index
      %c0_33 = arith.constant 0 : index
      %33 = vector.load %arg6[%c0_32, %c0_33] : memref<8x512xf32, #tpu.memory_space<vmem>>, vector<8x512xf32>
      %34 = vector.shape_cast %33 : vector<8x512xf32> to vector<1x8x512xf32>
      %cst_34 = arith.constant dense<0.000000e+00> : vector<1xf32>
      %35 = vector.multi_reduction <add>, %34, %cst_34 [1, 2] : vector<1x8x512xf32> to vector<1xf32>
      %36 = vector.shape_cast %35 : vector<1xf32> to vector<1x1x1xf32>
      %37 = vector.extract %36[0, 0, 0] : f32 from vector<1x1x1xf32>
      %c0_35 = arith.constant 0 : index
      %c0_36 = arith.constant 0 : index
      %38 = vector.load %arg7[%c0_35, %c0_36] : memref<8x512xf32, #tpu.memory_space<vmem>>, vector<8x512xf32>
      %39 = vector.shape_cast %38 : vector<8x512xf32> to vector<1x8x512xf32>
      %cst_37 = arith.constant dense<0.000000e+00> : vector<1xf32>
      %40 = vector.multi_reduction <add>, %39, %cst_37 [1, 2] : vector<1x8x512xf32> to vector<1xf32>
      %41 = vector.shape_cast %40 : vector<1xf32> to vector<1x1x1xf32>
      %42 = vector.extract %41[0, 0, 0] : f32 from vector<1x1x1xf32>
      %c0_38 = arith.constant 0 : index
      %c0_39 = arith.constant 0 : index
      %43 = vector.load %arg8[%c0_38, %c0_39] : memref<8x512xf32, #tpu.memory_space<vmem>>, vector<8x512xf32>
      %44 = vector.shape_cast %43 : vector<8x512xf32> to vector<1x8x512xf32>
      %cst_40 = arith.constant dense<0.000000e+00> : vector<1xf32>
      %45 = vector.multi_reduction <add>, %44, %cst_40 [1, 2] : vector<1x8x512xf32> to vector<1xf32>
      %46 = vector.shape_cast %45 : vector<1xf32> to vector<1x1x1xf32>
      %47 = vector.extract %46[0, 0, 0] : f32 from vector<1x1x1xf32>
      %c0_41 = arith.constant 0 : index
      %c0_42 = arith.constant 0 : index
      %48 = vector.load %arg9[%c0_41, %c0_42] : memref<8x512xf32, #tpu.memory_space<vmem>>, vector<8x512xf32>
      %49 = vector.shape_cast %48 : vector<8x512xf32> to vector<1x8x512xf32>
      %cst_43 = arith.constant dense<0.000000e+00> : vector<1xf32>
      %50 = vector.multi_reduction <add>, %49, %cst_43 [1, 2] : vector<1x8x512xf32> to vector<1xf32>
      %51 = vector.shape_cast %50 : vector<1xf32> to vector<1x1x1xf32>
      %52 = vector.extract %51[0, 0, 0] : f32 from vector<1x1x1xf32>
      %53 = arith.mulf %32, %37 : f32
      %cst_44 = arith.constant 2.500000e-04 : f32
      %54 = arith.mulf %53, %cst_44 : f32
      %55 = arith.subf %42, %54 : f32
      %56 = arith.mulf %37, %37 : f32
      %cst_45 = arith.constant 2.500000e-04 : f32
      %57 = arith.mulf %56, %cst_45 : f32
      %58 = arith.subf %52, %57 : f32
      %59 = arith.mulf %32, %32 : f32
      %cst_46 = arith.constant 2.500000e-04 : f32
      %60 = arith.mulf %59, %cst_46 : f32
      %61 = arith.subf %47, %60 : f32
      %cst_47 = arith.constant 9.99999993E-9 : f32
      %62 = arith.addf %58, %cst_47 : f32
      %63 = arith.divf %55, %62 : f32
      %64 = arith.mulf %63, %63 : f32
      %65 = arith.mulf %64, %58 : f32
      %cst_48 = arith.constant 2.000000e+00 : f32
      %66 = arith.mulf %cst_48, %63 : f32
      %67 = arith.mulf %66, %55 : f32
      %68 = arith.subf %61, %67 : f32
      %69 = arith.addf %68, %65 : f32
      %cst_49 = arith.constant 9.99999993E-9 : f32
      %70 = arith.addf %69, %cst_49 : f32
      %71 = arith.divf %65, %70 : f32
      %cst_50 = arith.constant 9.99999993E-9 : f32
      %72 = arith.addf %71, %cst_50 : f32
      %73 = math.log %72 : f32
      %cst_51 = arith.constant 0.434294492 : f32
      %74 = arith.mulf %73, %cst_51 : f32
      %cst_52 = arith.constant 1.000000e+01 : f32
      %75 = arith.mulf %cst_52, %74 : f32
      %76 = vector.broadcast %75 : f32 to vector<1x8x128xf32>
      %c0_53 = arith.constant 0 : index
      %c0_54 = arith.constant 0 : index
      %c0_55 = arith.constant 0 : index
      %77 = vector.load %arg4[%c0_53, %c0_54, %c0_55] : memref<1x8x128xf32, #tpu.memory_space<vmem>>, vector<1x8x128xf32>
      tpu.vector_store %arg4[%c0_53, %c0_54, %c0_55], %76 {strides = array<i32>} : memref<1x8x128xf32, #tpu.memory_space<vmem>>, vector<1x8x128xf32>,
    } else {
    }
    return
  }
  func.func @transform_0(%arg0: i32, %arg1: i32) -> (i32, i32, i32, i32) {
    %c0_i32 = arith.constant 0 : i32
    %c0_i32_0 = arith.constant 0 : i32
    %c0_i32_1 = arith.constant 0 : i32
    return %arg0, %arg1, %c0_i32, %c0_i32_0 : i32, i32, i32, i32
  }
  func.func @transform_1(%arg0: i32, %arg1: i32) -> (i32, i32, i32, i32) {
    %c0_i32 = arith.constant 0 : i32
    %c0_i32_0 = arith.constant 0 : i32
    %c0_i32_1 = arith.constant 0 : i32
    return %arg0, %arg1, %c0_i32, %c0_i32_0 : i32, i32, i32, i32
  }
  func.func @transform_2(%arg0: i32, %arg1: i32) -> (i32, i32, i32) {
    %c0_i32 = arith.constant 0 : i32
    %c0_i32_0 = arith.constant 0 : i32
    %c0_i32_1 = arith.constant 0 : i32
    return %arg0, %c0_i32, %c0_i32_0 : i32, i32, i32
  }
}

</mosaic_0001>

<bundles_post_ra>
// kernel: tpu_custom_call.1
= control target key start
LH: loop header
LB: loop body
LE: loop exit
PB: predicated region body
PF: predicated region fallthrough
CT: control target
= control target key end

     0   :  { %s1056_s0 = inlined_call_operand.hbm [shape: f32[2,1,8,512], index: 0, kind: input, shape index: {}]   ;;  %s1057_s1 = inlined_call_operand.hbm [shape: f32[2,1,8,512], index: 1, kind: input, shape index: {}]   ;;  %s1058_s2 = inlined_call_operand.hbm [shape: f32[2,8,128], index: 2, kind: output, shape index: {}]  }
   0x1   :  { %1061 = sst [smem:[#allocation16_spill]] %s1056_s0 }
   0x2   :  { %1062 = sst [smem:[#allocation17_spill]] %s1057_s1 }
   0x3   :  { %7 = vsyncpa [#allocation8], 0 }
   0x4   :  { %9 = vsyncpa [#allocation8 + $0x1], 0 }
   0x5   :  { %10 = vsyncpa [#allocation11], 0 }
   0x6   :  { %12 = vsyncpa [#allocation11 + $0x1], 0 }
   0x7   :  { %13 = vsyncpa [#allocation9], 0 }
   0x8   :  { %15 = vsyncpa [#allocation9 + $0x1], 0  ;;  %s835_s9 = smov 0   ;;  %s837_s10 = smov 0  }
   0x9   :  { %s839_s11 = smov 0   ;;  %s841_s12 = smov 0  }
   0xa   :  { %s843_s13 = smov 0   ;;  %s845_s14 = smov 0  }
   0xb LB: > { %s560_s15 = sadd.s32 4294967295, %s815_s14   ;;  %s561_s16 = sadd.s32 4294967294, %s815_s14   ;;  %s815_s14 = sphi %s845_s14, %s21_s14   ;;  %s811_s13 = sphi %s843_s13, %s1082_s13   ;;  %s807_s12 = sphi %s841_s12, %s1081_s12   ;;  %s803_s11 = sphi %s839_s11, %s1080_s11   ;;  %s799_s10 = sphi %s837_s10, %s1079_s10   ;;  %s795_s9 = sphi %s835_s9, %s1078_s9  }
   0xc   : > { %s33_s17 = sadd.s32 1, %s811_s13  ;;  %s42_s18 = sadd.s32 1, %s803_s11 }
   0xd   : > { %p35_p0 = scmp.ge.s32.totalorder %s33_s17, 2  ;;  %p49_p1 = scmp.ne.s32.totalorder %s803_s11, %s799_s10 }
   0xe   : > { %p50_p2 = scmp.eq.s32.totalorder %s815_s14, 0  ;;  %p55_p3 = scmp.ne.s32.totalorder %s799_s10, %s795_s9 }
   0xf   : > { %s1084_s17 = smov (%p35_p0, %s33_s17), 0  ;;  %p56_p5 = scmp.eq.s32.totalorder %s560_s15, 0 }
  0x10   : > { %p876_p4 = por %p50_p2, %p49_p1  ;;  %s37_s20 = ssub.s32 %s811_s13, %s1084_s17 }
  0x11   : > { %p107_p6 = scmp.eq.s32.totalorder %s560_s15, 1  ;;  %p40_p7 = scmp.eq.s32.totalorder %s37_s20, 0 }
  0x12   : > { %p882_p8 = por %p56_p5, %p55_p3  ;;  %p113_p10 = scmp.eq.s32.totalorder %s561_s16, 1 }
  0x13   : > { %p886_p9 = por %p107_p6, %p49_p1  ;;  %p613_p13 = scmp.lt.s32.totalorder %s815_s14, 2 }
  0x14   : > { %s1064_s21 = scalar_select %p882_p8, 1, 0 }
  0x15   : > { %s1065_s22 = scalar_select %p886_p9, 1, 0 }
  0x16   : > { %s891_s23 = scalar_select %p40_p7, %s803_s11, %s42_s18  }
  0x17   : > { %p893_p11 = por %p113_p10, %p55_p3  ;;  %s900_s25 = sand.u32 1, %s803_s11  }
  0x18   : > { %s564_s26 = sshll.u32 %s900_s25, 5  ;;  %s578_s27 = sshll.u32 %s811_s13, 9 }
  0x19   : > { %s1066_s24 = scalar_select %p893_p11, 1, 0 }
  0x1a   : > { %s1067_s0 = sld [smem:[#allocation16_spill]]  ;;  %s137_s3 = scalar_lea.vmem [#allocation7], %s564_s26 }
  0x1b   : > { %s147_s4 = sshll.u32 %s137_s3, 4  ;;  %p917_p0 = pnand %p613_p13, %p876_p4  ;;  %s913_s4 = int_to_ptr.vmem [resolvable:$true] %s147_s4 }
  0x1c   : > { %s134_s6 = scalar_lea.sflag [#allocation8], %s900_s25 }
  0x1d   : > { %p671_p5 = pneg %p917_p0 }
  0x20   : > { %s909_s30 = scalar_lea.hbm %s1067_s0, %s578_s27  ;;  %s674_s16 = scalar_lea.hbm %s1067_s0, 1024 }
  0x21   : > { %s669_s7 = scalar_lea.hbm %s909_s30, 512  ;;  %p675_p4 = scmp.lt.u32.totalorder %s909_s30, %s1067_s0 }
  0x22   : > { %p670_p3 = scmp.ne.s32.totalorder %s909_s30, %s669_s7  ;;  %p676_p10 = scmp.lt.u32.totalorder %s674_s16, %s669_s7 }
  0x23   : > { %p678_p12 = scmp.lt.u32.totalorder %s669_s7, %s909_s30 }
  0x24   : > { %p672_p6 = pnand %p671_p5, %p670_p3  ;;  %p677_p13 = por %p676_p10, %p675_p4 }
  0x26   : > { %p673_p7 = pneg %p672_p6  ;;  %p679_p1 = por %p678_p12, %p677_p13 }
  0x28   : > { %p680_p2 = pnand %p679_p1, %p673_p7 }
  0x2a   : > { %683 = shalt.err (!%p680_p2)
}
  0x2b   : > { %s684_s20 = scalar_lea.vmem %s913_s4, 512  ;;  %s817_s28 = smov [#allocation7]  }
  0x2c   : > { %p685_p3 = scmp.ne.s32.totalorder %s913_s4, %s684_s20  ;;  %s689_s29 = sshll.u32 %s817_s28, 4  ;;  %s690_s29 = int_to_ptr.vmem [resolvable:$false] %s689_s29 }
  0x2d   : > { %s691_s3 = scalar_lea.vmem %s690_s29, 1024  ;;  %p692_p9 = scmp.lt.s32.totalorder %s913_s4, %s690_s29 }
  0x2e   : > { %p687_p6 = pnand %p685_p3, %p671_p5  ;;  %p693_p4 = scmp.lt.s32.totalorder %s691_s3, %s684_s20 }
  0x30   : > { %p688_p11 = pneg %p687_p6  ;;  %p694_p10 = por %p693_p4, %p692_p9 }
  0x32   : > { %p695_p12 = pnand %p694_p10, %p688_p11 }
  0x34   : > { %698 = shalt.err (!%p695_p12)
}
  0x35   : > { %605 = dma.hbm_to_vmem [thread:$0]  (!%p917_p0), %s909_s30, 512, %s913_s4, %s134_s6  }
  0x36   : > { %p1069_p1 = scmp.lt.s32.totalorder %s815_s14, 3  ;;  %p1070_p2 = scmp.ge.s32.totalorder %s815_s14, 1 }
  0x37   : > { %s1072_s1 = sld [smem:[#allocation17_spill]]  ;;  %s158_s18 = scalar_lea.vmem [#allocation10], %s564_s26 }
  0x38   : > { %p953_p7 = pnand %p1070_p2, %p1069_p1  ;;  %s168_s19 = sshll.u32 %s158_s18, 4  ;;  %s169_s19 = int_to_ptr.vmem [resolvable:$true] %s168_s19 }
  0x39   : > { %s155_s30 = scalar_lea.sflag [#allocation11], %s900_s25 }
  0x3a   : > { %s1071_s7 = scalar_select %p953_p7, 1, 0 }
  0x3d   : > { %s962_s16 = scalar_lea.hbm %s1072_s1, %s578_s27  ;;  %s704_s27 = scalar_lea.hbm %s1072_s1, 1024 }
  0x3e   : > { %s699_s4 = scalar_lea.hbm %s962_s16, 512  ;;  %p705_p3 = scmp.lt.u32.totalorder %s962_s16, %s1072_s1 }
  0x3f   : > { %p700_p9 = scmp.ne.s32.totalorder %s962_s16, %s699_s4  ;;  %p706_p6 = scmp.lt.u32.totalorder %s704_s27, %s699_s4 }
  0x40   : > { %p708_p10 = scmp.lt.u32.totalorder %s699_s4, %s962_s16 }
  0x41   : > { %p702_p11 = pnand %p700_p9, %p671_p5  ;;  %p707_p4 = por %p706_p6, %p705_p3 }
  0x43   : > { %p703_p13 = pneg %p702_p11  ;;  %p709_p12 = por %p708_p10, %p707_p4 }
  0x45   : > { %p710_p1 = pnand %p709_p12, %p703_p13 }
  0x47   : > { %713 = shalt.err (!%p710_p1)
}
  0x48   : > { %s714_s25 = scalar_lea.vmem %s169_s19, 512  ;;  %s818_s26 = smov [#allocation10]  }
  0x49   : > { %p715_p2 = scmp.ne.s32.totalorder %s169_s19, %s714_s25  ;;  %s719_s3 = sshll.u32 %s818_s26, 4  ;;  %s720_s3 = int_to_ptr.vmem [resolvable:$false] %s719_s3 }
  0x4a   : > { %s721_s8 = scalar_lea.vmem %s720_s3, 1024  ;;  %p722_p8 = scmp.lt.s32.totalorder %s169_s19, %s720_s3 }
  0x4b   : > { %p717_p9 = pnand %p715_p2, %p671_p5  ;;  %p723_p7 = scmp.lt.s32.totalorder %s721_s8, %s714_s25 }
  0x4d   : > { %p718_p11 = pneg %p717_p9  ;;  %p724_p3 = por %p723_p7, %p722_p8 }
  0x4f   : > { %p725_p6 = pnand %p724_p3, %p718_p11 }
  0x51   : > { %728 = shalt.err (!%p725_p6)
}
  0x52   : > { %608 = dma.hbm_to_vmem [thread:$0]  (!%p917_p0), %s962_s16, 512, %s169_s19, %s155_s30  }
  0x53   : > { %p1073_p13 = scmp.ne.s32.totalorder %s1071_s7, 0 }
  0x54   : > { %s989_s15 = sand.u32 (!%p1073_p13), 1, %s799_s10   ;;  %p1074_p5 = scmp.ne.s32.totalorder (!%p1073_p13), %s1064_s21, 0 }
  0x55   : > { %177 = sbr.rel (%p1073_p13) target bundleno = 544 (0x220), region = 28  ;;  %s571_s18 = sshll.u32 (!%p1073_p13), %s989_s15, 5 }
  0x56   : > { %s180_s4 = scalar_lea.sflag (!%p1073_p13), [#allocation8], %s989_s15  ;;  %s183_s6 = scalar_lea.vmem (!%p1073_p13), [#allocation7], %s571_s18 }
  0x5c   : > { %782 = dma.done.wait (%p1074_p5), %s180_s4, 512  }
  0x5d   : > { %784 = vsyncadd (%p1074_p5), %s180_s4, 4294966784  ;;  %s189_s5 = scalar_lea.sflag [#allocation11], %s989_s15  ;;  %s192_s16 = scalar_lea.vmem [#allocation10], %s571_s18 }
  0x5e   : > { %786 = dma.done.wait (%p1074_p5), %s189_s5, 512  }
  0x5f   : > { %788 = vsyncadd (%p1074_p5), %s189_s5, 4294966784  ;;  %v242_v0 = vld [vmem:[%s183_s6] sm:$0xff]  ;;  %v243_v1 = vld [vmem:[%s183_s6 + $0x8] sm:$0xff]  ;;  %p1075_p0 = scmp.ne.s32.totalorder %s1065_s22, 0 }
  0x60   : > { %v244_v2 = vld [vmem:[%s183_s6 + $0x10] sm:$0xff]  ;;  %v245_v3 = vld [vmem:[%s183_s6 + $0x18] sm:$0xff]  ;;  %v329_v4 = vadd.f32 %v243_v1, %v242_v0  ;;  %v246_v5 = vld [vmem:[%s192_s16] sm:$0xff]  ;;  %v294_v7 = vmul.f32 %v242_v0, %v242_v0  ;;  %v295_v8 = vmul.f32 %v243_v1, %v243_v1 }
  0x61   : > { %v247_v6 = vld [vmem:[%s192_s16 + $0x8] sm:$0xff]  ;;  %v248_v9 = vld [vmem:[%s192_s16 + $0x10] sm:$0xff]  ;;  %v249_v10 = vld [vmem:[%s192_s16 + $0x18] sm:$0xff]  ;;  %v278_v11 = vmul.f32 %v246_v5, %v242_v0  ;;  %v296_v14 = vmul.f32 %v244_v2, %v244_v2  ;;  %v310_v21 = vmul.f32 %v246_v5, %v246_v5  ;;  %v297_v26 = vmul.f32 %v245_v3, %v245_v3 }
  0x62   : > { %v279_v12 = vmul.f32 %v247_v6, %v243_v1  ;;  %v345_v13 = vadd.f32 %v247_v6, %v246_v5  ;;  %v330_v15 = vadd.f32 %v329_v4, %v244_v2  ;;  %v280_v16 = vmul.f32 %v248_v9, %v244_v2 }
  0x63   : > { %v281_v17 = vmul.f32 %v249_v10, %v245_v3  ;;  %v377_v18 = vadd.f32 %v295_v8, %v294_v7  ;;  %v311_v22 = vmul.f32 %v247_v6, %v247_v6  ;;  %v312_v24 = vmul.f32 %v248_v9, %v248_v9 }
  0x64   : > { %v361_v19 = vadd.f32 %v279_v12, %v278_v11  ;;  %v346_v20 = vadd.f32 %v345_v13, %v248_v9  ;;  %v331_v23 = vadd.f32 %v330_v15, %v245_v3  ;;  %v313_v30 = vmul.f32 %v249_v10, %v249_v10 }
  0x65   : > { %v378_v27 = vadd.f32 %v377_v18, %v296_v14  ;;  %v393_v28 = vadd.f32 %v311_v22, %v310_v21 }
  0x66   : > { %v362_v25 = vadd.f32 %v361_v19, %v280_v16  ;;  %332 = vadd.xlane.f32.xlu0 %v331_v23  ;;  %v347_v29 = vadd.f32 %v346_v20, %v249_v10 }
  0x67   : > { %v394_v32 = vadd.f32 %v393_v28, %v312_v24  ;;  %v379_v33 = vadd.f32 %v378_v27, %v297_v26 }
  0x68   : > { %v363_v31 = vadd.f32 %v362_v25, %v281_v17 }
  0x69   : > { %v395_v34 = vadd.f32 %v394_v32, %v313_v30 }
  0x6a   : > { %364 = vadd.xlane.f32.xlu1 %v363_v31  ;;  %348 = vadd.xlane.f32.xlu0 %v347_v29 }
  0x6e   : > { %380 = vadd.xlane.f32.xlu1 %v379_v33  ;;  %396 = vadd.xlane.f32.xlu0 %v395_v34 }
  0xf3   : > { %v333_v35 = vpop.xlane.xlu0 %332 }
  0xf4   : > { %v334_v36 = vrot.slane %v333_v35, 4 }
  0xf6   : > { %v335_v37 = vadd.f32 %v334_v36, %v333_v35 }
  0xf7   : > { %v365_v38 = vpop.xlane.xlu1 %364  ;;  %v349_v40 = vpop.xlane.xlu0 %348 }
  0xf8   : > { %v366_v39 = vrot.slane %v365_v38, 4  ;;  %v336_v41 = vrot.slane %v335_v37, 2  ;;  %v350_v42 = vrot.slane %v349_v40, 4 }
  0xfa   : > { %v367_v43 = vadd.f32 %v366_v39, %v365_v38  ;;  %v351_v44 = vadd.f32 %v350_v42, %v349_v40  ;;  %v337_v46 = vadd.f32 %v336_v41, %v335_v37 }
  0xfb   : > { %v381_v45 = vpop.xlane.xlu1 %380  ;;  %v397_v49 = vpop.xlane.xlu0 %396 }
  0xfc   : > { %v368_v47 = vrot.slane %v367_v43, 2  ;;  %v382_v48 = vrot.slane %v381_v45, 4  ;;  %v352_v50 = vrot.slane %v351_v44, 2  ;;  %v398_v51 = vrot.slane %v397_v49, 4 }
  0xfd   : > { %v338_v52 = vrot.slane %v337_v46, 1 }
  0xfe   : > { %v383_v53 = vadd.f32 %v382_v48, %v381_v45  ;;  %v369_v54 = vadd.f32 %v368_v47, %v367_v43  ;;  %v399_v55 = vadd.f32 %v398_v51, %v397_v49  ;;  %v353_v57 = vadd.f32 %v352_v50, %v351_v44 }
  0xff   : > { %v339_v56 = vadd.f32 %v338_v52, %v337_v46 }
 0x100   : > { %v384_v58 = vrot.slane %v383_v53, 2  ;;  %v370_v59 = vrot.slane %v369_v54, 1  ;;  %v400_v60 = vrot.slane %v399_v55, 2  ;;  %v354_v61 = vrot.slane %v353_v57, 1 }
 0x101   : > { %580 = vpush %v339_v56 }
 0x102   : > { %v385_v62 = vadd.f32 %v384_v58, %v383_v53  ;;  %v401_v63 = vadd.f32 %v400_v60, %v399_v55  ;;  %v355_v0 = vadd.f32 %v354_v61, %v353_v57  ;;  %v371_v1 = vadd.f32 %v370_v59, %v369_v54 }
 0x104   : > { %v386_v2 = vrot.slane %v385_v62, 1  ;;  %582 = vpush %v355_v0  ;;  %v402_v3 = vrot.slane %v401_v63, 1 }
 0x105   : > { %584 = vpush %v371_v1 }
 0x106   : > { %v387_v4 = vadd.f32 %v386_v2, %v385_v62  ;;  %v403_v5 = vadd.f32 %v402_v3, %v401_v63 }
 0x108   : > { %586 = vpush %v387_v4 }
 0x109   : > { %588 = vpush %v403_v5 }
 0x132   : > { %s581_s21 = spop %580 }
 0x133   : > { %s411_s7 = smul.f32 %s581_s21, %s581_s21 }
 0x135   : > { %s412_s19 = smul.f32 0.00025, %s411_s7  ;;  %s583_s30 = spop %582 }
 0x136   : > { %s405_s20 = smul.f32 %s583_s30, %s581_s21  ;;  %s585_s28 = spop %584 }
 0x137   : > { %s408_s27 = smul.f32 %s583_s30, %s583_s30 }
 0x138   : > { %s406_s29 = smul.f32 0.00025, %s405_s20 }
 0x139   : > { %s587_s25 = spop %586  ;;  %s409_s26 = smul.f32 0.00025, %s408_s27 }
 0x13a   : > { %s413_s3 = ssub.f32 %s587_s25, %s412_s19  ;;  %s589_s18 = spop %588 }
 0x13b   : > { %s407_s8 = ssub.f32 %s585_s28, %s406_s29 }
 0x13c   : > { %s410_s4 = ssub.f32 %s589_s18, %s409_s26 }
 0x13e   : > { %s414_s6 = sadd.f32 1e-08, %s410_s4 }
 0x140   : > { %v415_v6 = vstv %s414_s6 }
 0x141   : > { %663 = vrcp.f32 %v415_v6 }
 0x14b   : > { %v664_v7 = vpop.eup %663 }
 0x14c   : > { %590 = vpush %v664_v7 }
 0x17d   : > { %s591_s5 = spop %590 }
 0x17e   : > { %s418_s16 = smul.f32 %s591_s5, %s407_s8 }
 0x180   : > { %s419_s0 = smul.f32 %s418_s16, %s418_s16 }
 0x181   : > { %s421_s7 = smul.f32 2.0, %s418_s16  ;;  %s440_s16 = scalar_lea.sflag [#allocation9], %s989_s15 }
 0x182   : > { %s420_s21 = smul.f32 %s419_s0, %s410_s4  ;;  %s573_s0 = sshll.u32 %s989_s15, 3 }
 0x183   : > { %s422_s1 = smul.f32 %s421_s7, %s407_s8 }
 0x185   : > { %s423_s30 = ssub.f32 %s413_s3, %s422_s1  ;;  %s575_s1 = sshll.u32 %s807_s12, 7 }
 0x186   : > { %s217_s3 = scalar_lea.vmem [#allocation12], %s573_s0  ;;  %s1007_s5 = scalar_lea.hbm %s1058_s2, %s575_s1 }
 0x187   : > { %s424_s20 = sadd.f32 %s423_s30, %s420_s21  ;;  %s453_s8 = sshll.u32 %s217_s3, 4  ;;  %s1009_s8 = int_to_ptr.vmem [resolvable:$true] %s453_s8 }
 0x188   : > { %s729_s7 = scalar_lea.vmem %s1009_s8, 128  ;;  %s819_s12 = smov [#allocation12]  }
 0x189   : > { %s425_s27 = sadd.f32 1e-08, %s424_s20  ;;  %p730_p8 = scmp.ne.s32.totalorder %s1009_s8, %s729_s7 }
 0x18b   : > { %v426_v8 = vstv %s425_s27  ;;  %p731_p7 = pnand %p730_p8, %p1075_p0 }
 0x18c   : > { %665 = vrcp.f32 %v426_v8 }
 0x18d   : > { %p732_p4 = pneg %p731_p7 }
 0x196   : > { %v666_v9 = vpop.eup %665 }
 0x197   : > { %592 = vpush %v666_v9 }
 0x1c8   : > { %s593_s19 = spop %592 }
 0x1c9   : > { %s429_s28 = smul.f32 %s593_s19, %s420_s21  ;;  %s733_s21 = sshll.u32 %s819_s12, 4  ;;  %s734_s21 = int_to_ptr.vmem [resolvable:$false] %s733_s21 }
 0x1ca   : > { %s735_s30 = scalar_lea.vmem %s734_s21, 256  ;;  %p736_p10 = scmp.lt.s32.totalorder %s1009_s8, %s734_s21 }
 0x1cb   : > { %s430_s29 = sadd.f32 1e-08, %s429_s28  ;;  %p737_p12 = scmp.lt.s32.totalorder %s735_s30, %s729_s7 }
 0x1cd   : > { %v431_v10 = vstv %s430_s29  ;;  %p738_p1 = por %p737_p12, %p736_p10 }
 0x1ce   : > { %667 = vlog2.f32 %v431_v10 }
 0x1cf   : > { %p739_p2 = pnand %p738_p1, %p732_p4 }
 0x1d8   : > { %v668_v11 = vpop.eup %667 }
 0x1d9   : > { %v433_v12 = vmul.f32 0.6931472, %v668_v11 }
 0x1db   : > { %594 = vpush %v433_v12 }
 0x20c   : > { %s595_s25 = spop %594 }
 0x20d   : > { %s435_s26 = smul.f32 0.4342945, %s595_s25 }
 0x20f   : > { %s436_s18 = smul.f32 10.0, %s435_s26 }
 0x211   : > { %v437_v13 = vstv %s436_s18 }
 0x212   : > { %438 = vst [vmem:[%s217_s3] sm:$0xff] %v437_v13 }
 0x213   : > { %742 = shalt.err (!%p739_p2)
}
 0x214   : > { %s743_s15 = scalar_lea.hbm %s1007_s5, 128  ;;  %s747_s19 = scalar_lea.hbm %s1058_s2, 256 }
 0x215   : > { %p744_p9 = scmp.ne.s32.totalorder %s1007_s5, %s743_s15  ;;  %p748_p6 = scmp.lt.u32.totalorder %s1007_s5, %s1058_s2 }
 0x216   : > { %p749_p13 = scmp.lt.u32.totalorder %s747_s19, %s743_s15  ;;  %p751_p8 = scmp.lt.u32.totalorder %s743_s15, %s1007_s5 }
 0x217   : > { %p745_p11 = pnand %p744_p9, %p1075_p0 }
 0x218   : > { %p750_p5 = por %p749_p13, %p748_p6 }
 0x219   : > { %p746_p3 = pneg %p745_p11 }
 0x21a   : > { %p752_p7 = por %p751_p8, %p750_p5 }
 0x21c   : > { %p753_p4 = pnand %p752_p7, %p746_p3 }
 0x21e   : > { %756 = shalt.err (!%p753_p4)
}
 0x21f   : > { %600 = dma.vmem_to_hbm [thread:$0]  (%p1075_p0), %s1009_s8, 128, %s1007_s5, %s440_s16  }
 0x220 PF: > { %s465_s0 = sand.u32 1, %s795_s9   ;;  %p1076_p10 = scmp.ne.s32.totalorder %s1066_s24, 0 }
 0x221   : > { %p1077_p12 = scmp.ge.s32.totalorder %s815_s14, 2  ;;  %s466_s25 = scalar_lea.sflag [#allocation9], %s465_s0 }
 0x223   : > { %p610_p1 = pnand %p1077_p12, %p1076_p10 }
 0x225   : > { %790 = dma.done.wait (!%p610_p1), %s466_s25, 128  }
 0x226   : > { %792 = vsyncadd (!%p610_p1), %s466_s25, 4294967168  ;;  %s21_s14 = sadd.s32 1, %s815_s14   ;;  %s1078_s9 = smov %s799_s10 }
 0x227   : > { %p18_p2 = scmp.ge.s32.totalorder %s21_s14, 4   ;;  %s1079_s10 = smov %s803_s11 }
 0x228   : > { %s1080_s11 = smov %s891_s23  ;;  %s1081_s12 = smov %s811_s13 }
 0x229   : > { %s1082_s13 = smov %s1084_s17  ;;  %20 = sbr.rel (!%p18_p2) target bundleno = 11 (0xb), region = 94 }
 0x230   :  { %471 = vsyncpa [#allocation8], 1 }
 0x231   :  { %473 = vsyncpa [#allocation8 + $0x1], 1 }
 0x232   :  { %474 = vsyncpa [#allocation11], 1 }
 0x233   :  { %476 = vsyncpa [#allocation11 + $0x1], 1 }
 0x234   :  { %477 = vsyncpa [#allocation9], 1 }
 0x235   :  { %479 = vsyncpa [#allocation9 + $0x1], 1 }

</bundles_post_ra>
